<compile_context>
chip_gen: v6e
topology: v6e:2x2x1
jax: 0.10.0
libtpu: 0.0.40
codegen_flags: <defaults>
</compile_context>

<pallas_src>
import functools
import math

import jax
import jax.numpy as jnp
from jax.experimental import pallas as pl
from jax.experimental.pallas import tpu as pltpu


_TARGET_BLOCK_BYTES = 8 * 1024 * 1024   # preferred output block per grid step
_VMEM_BUDGET_BYTES = 24 * 1024 * 1024   # 2x block (double buffer) + pattern temps


def _ij_guide_kernel(s_ref, o_ref, *, w, norm, hw_blk):
    r_blk = o_ref.shape[0]
    pat_rows = 8 if r_blk >= 8 else r_blk

    # Hoisted grid-invariant scalar: 1 / (sqrt(h^2 + w^2) * s_ij).
    scale = 1.0 / (jnp.float32(norm) * s_ref[0])

    # Flattened pixel index of every lane in this lane block (exact int32).
    lane0 = pl.program_id(1) * hw_blk
    p_i = lane0 + jax.lax.broadcasted_iota(jnp.int32, (pat_rows, hw_blk), 1)

    if w & (w - 1) == 0:
        # Power-of-two width: exact shift/AND, valid for any image size.
        shift = int(w).bit_length() - 1
        i_val = (p_i >> shift).astype(jnp.float32)
        j_val = (p_i & (w - 1)).astype(jnp.float32)
    else:
        # floor(p / w) and p mod w via multiply-by-reciprocal + remainder
        # fixup.  The +/-1 correction makes this robust even if the multiply
        # is not correctly rounded; exact for h*w < 2^24 (pixel index exactly
        # representable in f32).
        # TODO(synk): images with more than ~16M pixels would need an
        # int32 / two-level iota path here.
        wf = jnp.float32(w)
        p = p_i.astype(jnp.float32)
        q = jnp.floor(p * jnp.float32(1.0 / w))
        rmd = p - q * wf
        q = jnp.where(rmd < 0.0, q - 1.0, q)
        rmd = jnp.where(rmd < 0.0, rmd + wf, rmd)
        q = jnp.where(rmd >= wf, q + 1.0, q)
        rmd = jnp.where(rmd >= wf, rmd - wf, rmd)
        i_val, j_val = q, rmd

    # Rows alternate channel i (even) / channel j (odd).  Blocks always start
    # on an even global row, so local row parity == channel index.
    par = jax.lax.broadcasted_iota(jnp.int32, (pat_rows, hw_blk), 0)
    pat = jnp.where((par & 1) == 0, i_val, j_val) * scale

    if r_blk == pat_rows:
        o_ref[...] = pat
    else:
        n_full = r_blk // 8

        @pl.loop(0, n_full)
        def _(t):
            o_ref[pl.ds(pl.multiple_of(t * 8, 8), 8), :] = pat

        rem = r_blk - n_full * 8
        if rem:
            o_ref[pl.ds(n_full * 8, rem), :] = pat[:rem]


def _pick_blocks(n_rows, hw):
    """Choose (r_blk, hw_blk) for the (n_rows, hw) f32 output.

    Tiling rule: r_blk is a multiple of 8 or equals n_rows; hw_blk is a
    multiple of 128 or equals hw.  Preferences, in order: double-buffered
    block plus pattern temporaries fit the VMEM budget; block under the
    ~8 MiB target; >= 2 grid steps for non-tiny outputs (v7x megacore);
    full-lane blocks (contiguous HBM writes); largest block (amortizes the
    ~0.35us per-grid-step overhead).
    """
    total_bytes = n_rows * hw * 4
    want_multi = total_bytes >= 2 * 1024 * 1024

    row_cands = [d for d in range(8, n_rows + 1, 8) if n_rows % d == 0]
    if n_rows not in row_cands:
        row_cands.append(n_rows)
    lane_cands = [d for d in range(128, hw + 1, 128) if hw % d == 0]
    if hw not in lane_cands:
        lane_cands.append(hw)

    best_key, best = None, None
    for r in row_cands:
        for l in lane_cands:
            blk = r * l * 4
            pat = min(8, r) * l * 4
            cost = 2 * blk + 6 * pat
            steps = (n_rows // r) * (hw // l)
            key = (
                cost <= _VMEM_BUDGET_BYTES,
                blk <= _TARGET_BLOCK_BYTES,
                (not want_multi) or steps >= 2,
                l == hw,
                blk if blk <= _TARGET_BLOCK_BYTES else -blk,
            )
            if best_key is None or key > best_key:
                best_key, best = key, (r, l)
    # TODO(synk): pathological shapes (bs<=1 with huge, non-128-multiple h*w)
    # can still yield a single oversized block; no realistic NCHW input hits it.
    return best


def ij_guide_forward(x, s_ij):
    """Pallas equivalent of ijGuide.forward.

    x:    any NCHW array (only its shape matters, as in the PyTorch module)
    s_ij: scalar float32 parameter
    """
    bs, _, h, w = x.shape
    hw = h * w
    n_rows = 2 * bs
    norm = math.sqrt(h * h + w * w)

    r_blk, hw_blk = _pick_blocks(n_rows, hw)
    grid = (n_rows // r_blk, hw // hw_blk)

    blk_bytes = r_blk * hw_blk * 4
    pat_bytes = min(8, r_blk) * hw_blk * 4
    vmem_limit = min(
        48 * 1024 * 1024,
        max(16 * 1024 * 1024, 2 * blk_bytes + 8 * pat_bytes + (2 << 20)),
    )

    s_arr = jnp.asarray(s_ij, dtype=jnp.float32).reshape((1,))

    out2d = pl.pallas_call(
        functools.partial(_ij_guide_kernel, w=w, norm=norm, hw_blk=hw_blk),
        out_shape=jax.ShapeDtypeStruct((n_rows, hw), jnp.float32),
        grid=grid,
        in_specs=[pl.BlockSpec(memory_space=pltpu.SMEM)],
        out_specs=pl.BlockSpec((r_blk, hw_blk), lambda r, c: (r, c)),
        compiler_params=pltpu.CompilerParams(
            dimension_semantics=("parallel", "parallel"),
            vmem_limit_bytes=vmem_limit,
        ),
    )(s_arr)

    # Contiguous (free) reshape back to NCHW: row r = b*2 + c, lane p = i*w + j.
    return out2d.reshape(bs, 2, h, w)


def ij_guide_reference(x, s_ij):
    """Pure-JAX reference for correctness checking."""
    bs, _, h, w = x.shape
    norm = math.sqrt(h * h + w * w)
    i = jnp.broadcast_to(jnp.arange(h, dtype=jnp.float32)[:, None], (h, w))
    j = jnp.broadcast_to(jnp.arange(w, dtype=jnp.float32)[None, :], (h, w))
    ij = jnp.stack([i, j], axis=0) / norm           # (2, h, w)
    ij = jnp.broadcast_to(ij[None], (bs, 2, h, w))  # tile over batch
    return ij / jnp.float32(s_ij)


if __name__ == "__main__":
    key = jax.random.PRNGKey(0)
    s_ij = jnp.float32(0.1)   # matches nn.Parameter(torch.tensor(0.1))

    # Primary small case: (bs=2, c=4, 16x16) — single full-array block.
    x0 = jax.random.normal(key, (2, 4, 16, 16), dtype=jnp.float32)
    out0 = jax.block_until_ready(ij_guide_forward(x0, s_ij))
    assert out0.shape == (2, 2, 16, 16) and out0.dtype == jnp.float32
    assert jnp.allclose(out0, ij_guide_reference(x0, s_ij), atol=1e-5, rtol=1e-5)

    # Non-power-of-two width (reciprocal + fixup path), bs=1 fallback path.
    x1 = jax.random.normal(key, (1, 3, 12, 24), dtype=jnp.float32)
    out1 = jax.block_until_ready(ij_guide_forward(x1, s_ij))
    assert jnp.allclose(out1, ij_guide_reference(x1, s_ij), atol=1e-5, rtol=1e-5)

    # Larger batch: exercises the 8-row pattern replication loop (r_blk > 8).
    x2 = jax.random.normal(key, (8, 3, 16, 16), dtype=jnp.float32)
    out2 = jax.block_until_ready(ij_guide_forward(x2, s_ij))
    assert jnp.allclose(out2, ij_guide_reference(x2, s_ij), atol=1e-5, rtol=1e-5)

    print("KERNEL_OK")
</pallas_src>

<mosaic_0001>
module attributes {stable_mosaic.version = 11 : i64} {
  func.func @_ij_guide_kernel(%arg0: i32, %arg1: i32, %arg2: memref<1xf32, #tpu.memory_space<smem>>, %arg3: memref<4x256xf32, #tpu.memory_space<vmem>>) attributes {dimension_semantics = [#tpu.dimension_semantics<parallel>, #tpu.dimension_semantics<parallel>], iteration_bounds = array<i64: 1, 1>, scalar_prefetch = 0 : i64, scratch_operands = 0 : i64, tpu.core_type = #tpu.core_type<tc>, window_params = [{transform_indices = @transform_0, window_bounds = array<i64: 1>}, {transform_indices = @transform_1, window_bounds = array<i64: 4, 256>}]} {
    %c0 = arith.constant 0 : index
    %0 = memref.load %arg2[%c0] : memref<1xf32, #tpu.memory_space<smem>>
    %cst = arith.constant 22.6274166 : f32
    %1 = arith.mulf %cst, %0 : f32
    %cst_0 = arith.constant 1.000000e+00 : f32
    %2 = arith.divf %cst_0, %1 : f32
    %c256_i32 = arith.constant 256 : i32
    %3 = arith.muli %arg1, %c256_i32 : i32
    %4 = tpu.iota {dimensions = array<i32: 1>} : vector<4x256xi32>
    %5 = vector.broadcast %3 : i32 to vector<4x256xi32>
    %6 = arith.addi %5, %4 : vector<4x256xi32>
    %c4_i32 = arith.constant 4 : i32
    %7 = vector.broadcast %c4_i32 : i32 to vector<4x256xi32>
    %8 = arith.shrsi %6, %7 : vector<4x256xi32>
    %9 = arith.sitofp %8 : vector<4x256xi32> to vector<4x256xf32>
    %c15_i32 = arith.constant 15 : i32
    %10 = vector.broadcast %c15_i32 : i32 to vector<4x256xi32>
    %11 = arith.andi %6, %10 : vector<4x256xi32>
    %12 = arith.sitofp %11 : vector<4x256xi32> to vector<4x256xf32>
    %13 = tpu.iota {dimensions = array<i32: 0>} : vector<4x256xi32>
    %c1_i32 = arith.constant 1 : i32
    %14 = vector.broadcast %c1_i32 : i32 to vector<4x256xi32>
    %15 = arith.andi %13, %14 : vector<4x256xi32>
    %c0_i32 = arith.constant 0 : i32
    %16 = vector.broadcast %c0_i32 : i32 to vector<4x256xi32>
    %17 = arith.cmpi eq, %15, %16 : vector<4x256xi32>
    %18 = arith.select %17, %9, %12 : vector<4x256xi1>, vector<4x256xf32>
    %19 = vector.broadcast %2 : f32 to vector<4x256xf32>
    %20 = arith.mulf %18, %19 : vector<4x256xf32>
    %c0_1 = arith.constant 0 : index
    %c0_2 = arith.constant 0 : index
    %21 = vector.load %arg3[%c0_1, %c0_2] : memref<4x256xf32, #tpu.memory_space<vmem>>, vector<4x256xf32>
    tpu.vector_store %arg3[%c0_1, %c0_2], %20 {strides = array<i32>} : memref<4x256xf32, #tpu.memory_space<vmem>>, vector<4x256xf32>,
    return
  }
  func.func @transform_0(%arg0: i32, %arg1: i32) -> i32 {
    %c0_i32 = arith.constant 0 : i32
    %c0_i32_0 = arith.constant 0 : i32
    return %c0_i32 : i32
  }
  func.func @transform_1(%arg0: i32, %arg1: i32) -> (i32, i32) {
    %c0_i32 = arith.constant 0 : i32
    return %arg0, %arg1 : i32, i32
  }
}

</mosaic_0001>

<bundles_post_ra>
// kernel: tpu_custom_call.1
= control target key start
LH: loop header
LB: loop body
LE: loop exit
PB: predicated region body
PF: predicated region fallthrough
CT: control target
= control target key end

     0   :  { %s102_s0 = inlined_call_operand.<no memory space> [shape: f32[1], index: 0, kind: input, shape index: {}]   ;;  %s103_s1 = inlined_call_operand.hbm [shape: f32[4,256], index: 1, kind: output, shape index: {}]  }
   0x1   :  { %s11_s8 = smul.f32 22.627417, %s102_s0 }
   0x2   :  { %7 = vsyncpa [#allocation4], 0  ;;  %v16_v2 = vlaneseq  ;;  %s85_s9 = smov [#allocation3]  }
   0x3   :  { %v12_v0 = vstv %s11_s8  ;;  %s50_s10 = sshll.u32 %s85_s9, 4  ;;  %s51_s10 = int_to_ptr.vmem [resolvable:$true] %s50_s10 }
   0x4   :  { %61 = vrcp.f32 %v12_v0  ;;  %v17_v3 = vand.u32 127, %v16_v2  ;;  %v31_v5 = vshrl.u32 %v16_v2, 7  ;;  %s63_s11 = scalar_lea.vmem %s51_s10, 128  ;;  %p68_p1 = scmp.lt.s32.totalorder %s51_s10, %s51_s10 }
   0x5   :  { %p64_p0 = scmp.ne.s32.totalorder %s51_s10, %s63_s11  ;;  %p69_p2 = scmp.lt.s32.totalorder %s63_s11, %s63_s11 }
   0x6   :  { %v18_v4 = vadd.s32 128, %v17_v3  ;;  %v22_v6 = vshra.s32 %v17_v3, 4  ;;  %v26_v8 = vand.u32 15, %v17_v3  ;;  %v32_v10 = vand.u32 1, %v31_v5 }
   0x7   :  { %p70_p3 = por %p69_p2, %p68_p1 }
   0x8   :  { %v23_v7 = vshra.s32 %v18_v4, 4  ;;  %v27_v9 = vand.u32 15, %v18_v4  ;;  %v24_v11 = vcvt.s32.f32 %v22_v6  ;;  %v28_v13 = vcvt.s32.f32 %v26_v8 }
   0x9   :  { %vm33_vm0 = vcmp.eq.s32.totalorder %v32_v10, 0  ;;  %p71_p4 = pnand %p70_p3, %p64_p0 }
   0xa   :  { %v25_v12 = vcvt.s32.f32 %v23_v7  ;;  %v29_v14 = vcvt.s32.f32 %v27_v9  ;;  %v34_v15 = vsel %vm33_vm0, %v24_v11, %v28_v13 }
   0xc   :  { %v35_v16 = vsel %vm33_vm0, %v25_v12, %v29_v14 }
  0x11   :  { %v62_v1 = vpop.eup %61 }
  0x12   :  { %58 = vpush %v62_v1 }
  0x43   :  { %s59_s0 = spop %58 }
  0x44   :  { %v36_v17 = vstv %s59_s0 }
  0x45   :  { %v37_v18 = vmul.f32 %v36_v17, %v34_v15  ;;  %v38_v19 = vmul.f32 %v36_v17, %v35_v16 }
  0x47   :  { %v41_v20 = vcombine.low %v37_v18, %v38_v19 }
  0x49   :  { %43 = vst [vmem:[#allocation3] sm:$0xff] %v41_v20 }
  0x4a   :  { %74 = shalt.err (!%p71_p4)
}
  0x4b   :  { %53 = dma.vmem_to_hbm [thread:$0]  %s51_s10, 128, %s103_s1, [#allocation4]  }
  0x4c   :  { %83 = dma.done.wait [#allocation4], 128  }
  0x4d   :  { %84 = vsyncadd [#allocation4], 4294967168 }
  0x4e   :  { %57 = vsyncpa [#allocation4], 1 }

</bundles_post_ra>
